<compile_context>
chip_gen: v7x
topology: tpu7x:2x2x1
jax: 0.10.0
libtpu: 0.0.40
codegen_flags: <defaults>
</compile_context>

<pallas_src>
import math
import functools

import jax
import jax.numpy as jnp
from jax.experimental import pallas as pl
from jax.experimental.pallas import tpu as pltpu


def _round_up(x: int, m: int) -> int:
    return ((x + m - 1) // m) * m


def _vmem_capacity_bytes(default: int = 64 * 1024 * 1024) -> int:
    """Physical VMEM per core; conservative fallback if the query fails."""
    try:
        info = pltpu.get_tpu_info()
        return int(getattr(info, "vmem_capacity_bytes", default))
    except Exception:
        return default


# --------------------------------------------------------------------------
# One-time weight preparation (keep casts / pads out of the forward pass)
# --------------------------------------------------------------------------
def prepare_decoder_weights(w1, b1, gamma, beta, w2, b2, *,
                            matmul_dtype=jnp.bfloat16):
    """Cast/reshape (and, only for awkward vocab sizes, pad) parameters once.

    w1: [input_size, hidden]   (pre-transposed Linear weight)
    b1, gamma, beta: [hidden]
    w2: [hidden, vocab]        (pre-transposed Linear weight)
    b2: [vocab]
    """
    d_in, hidden = w1.shape
    hidden2, vocab = w2.shape
    assert hidden2 == hidden

    v_pad = _round_up(vocab, 128)
    w2c = w2.astype(matmul_dtype)
    b2r = b2.reshape(1, vocab).astype(jnp.float32)
    if v_pad != vocab:
        # TODO(synk): vocab sizes that are not multiples of 128 get a one-time
        # pad here and a per-call slice of the logits in decoder_forward.
        w2c = jnp.pad(w2c, ((0, 0), (0, v_pad - vocab)))
        b2r = jnp.pad(b2r, ((0, 0), (0, v_pad - vocab)))

    return {
        "w1": w1.astype(matmul_dtype),
        "b1": b1.reshape(1, hidden).astype(jnp.float32),
        "gamma": gamma.reshape(1, hidden).astype(jnp.float32),
        "beta": beta.reshape(1, hidden).astype(jnp.float32),
        "w2": w2c,
        "b2": b2r,
        "vocab": vocab,
    }


# --------------------------------------------------------------------------
# Stage 1: h = LayerNorm(GELU(x @ W1 + b1))
#   matmul operands in matmul_dtype, accumulation + GELU/LN math in f32
# --------------------------------------------------------------------------
def _stage1_kernel(x_ref, w1_ref, b1_ref, g_ref, beta_ref, h_ref, *, eps):
    inv_sqrt2 = 1.0 / math.sqrt(2.0)
    h = jnp.dot(x_ref[...], w1_ref[...],
                preferred_element_type=jnp.float32) + b1_ref[...]
    # exact (erf-based) GELU, matching torch.nn.GELU() default
    h = 0.5 * h * (1.0 + jax.lax.erf(h * inv_sqrt2))
    mean = jnp.mean(h, axis=-1, keepdims=True)
    var = jnp.mean((h - mean) * (h - mean), axis=-1, keepdims=True)
    h = (h - mean) * jax.lax.rsqrt(var + eps)
    h = h * g_ref[...] + beta_ref[...]
    h_ref[...] = h.astype(h_ref.dtype)


# --------------------------------------------------------------------------
# Stage 2: logits tile = h_rows @ W2_tile + bias_tile
#   h_resident=True: h ref holds ALL rows (DMA'd once); slice rows in-kernel.
# --------------------------------------------------------------------------
def _stage2_kernel(h_ref, w2_ref, b2_ref, o_ref, *, h_resident, tm):
    if h_resident:
        start = pl.multiple_of(pl.program_id(1) * tm, tm)
        h = h_ref[pl.ds(start, tm), :]
    else:
        h = h_ref[...]
    o_ref[...] = (jnp.dot(h, w2_ref[...], preferred_element_type=jnp.float32)
                  + b2_ref[...]).astype(o_ref.dtype)


# --------------------------------------------------------------------------
# Forward
# --------------------------------------------------------------------------
def decoder_forward(x, params, *,
                    layer_norm_eps=1e-12,
                    row_tile=512,            # rows per stage-2 step (mult. of 8)
                    out_dtype=jnp.float32):  # bfloat16 halves logits HBM write
    """x: [batch, seq, input_size] -> logits [batch, seq, vocab_size]."""
    w1, b1 = params["w1"], params["b1"]
    gamma, beta = params["gamma"], params["beta"]
    w2, b2 = params["w2"], params["b2"]
    vocab = params["vocab"]

    batch, seq, d_in = x.shape
    hidden = w1.shape[1]
    v_pad = w2.shape[1]
    n = batch * seq

    matmul_dtype = w1.dtype
    mm_bytes = jnp.dtype(matmul_dtype).itemsize
    out_bytes = jnp.dtype(out_dtype).itemsize

    assert row_tile % 8 == 0, "row_tile must be a multiple of 8 (sublane align)"

    # ---- per-generation VMEM budget & vocab-tile target -------------------
    vmem_phys = _vmem_capacity_bytes()
    if vmem_phys >= 100 * 1024 * 1024:        # v5e / v6e: 128 MiB physical
        vmem_cap, tv_target = 96 * 1024 * 1024, 4096
    else:                                      # v7x: 64 MiB per TensorCore
        vmem_cap, tv_target = 48 * 1024 * 1024, 2048

    # ---- row tiling --------------------------------------------------------
    n8 = _round_up(n, 8)
    tm = min(row_tile, n8)
    n_pad = _round_up(n, tm)

    # h fully VMEM-resident in stage 2 when small: HBM-read exactly once.
    h_resident = (2 * n_pad * hidden * mm_bytes) <= 8 * 1024 * 1024

    # ---- vocab tiling: 128-multiple divisor of v_pad, fits VMEM budget -----
    def stage2_bytes(tv_):
        h_b = 2 * (n_pad if h_resident else tm) * hidden * mm_bytes
        return (2 * hidden * tv_ * mm_bytes        # W2 tile (double buffered)
                + 2 * tm * tv_ * out_bytes         # logits tile
                + 2 * tv_ * 4                      # bias tile
                + h_b)

    tv = min(tv_target, v_pad)
    tv -= tv % 128
    tv = max(tv, 128)
    while tv > 128 and (v_pad % tv != 0 or stage2_bytes(tv) > vmem_cap):
        tv -= 128

    # ---- prepare activations (cheap: only x is touched per call) ----------
    x2 = x.reshape(n, d_in).astype(matmul_dtype)
    if n_pad != n:
        # Padded rows run GELU+LayerNorm with zero variance (rsqrt(eps));
        # finite values, sliced off below — intentionally left as-is.
        x2 = jnp.pad(x2, ((0, n_pad - n), (0, 0)))

    # ---- Stage 1: h = LN(GELU(x @ W1 + b1)) --------------------------------
    h = pl.pallas_call(
        functools.partial(_stage1_kernel, eps=layer_norm_eps),
        out_shape=jax.ShapeDtypeStruct((n_pad, hidden), matmul_dtype),
        grid_spec=pltpu.PrefetchScalarGridSpec(
            num_scalar_prefetch=0,
            grid=(n_pad // tm,),
            in_specs=[
                pl.BlockSpec((tm, d_in),     lambda i: (i, 0)),   # x rows
                pl.BlockSpec((d_in, hidden), lambda i: (0, 0)),   # W1 (resident)
                pl.BlockSpec((1, hidden),    lambda i: (0, 0)),   # b1
                pl.BlockSpec((1, hidden),    lambda i: (0, 0)),   # LN gamma
                pl.BlockSpec((1, hidden),    lambda i: (0, 0)),   # LN beta
            ],
            out_specs=pl.BlockSpec((tm, hidden), lambda i: (i, 0)),
        ),
        compiler_params=pltpu.CompilerParams(
            dimension_semantics=("parallel",),
            vmem_limit_bytes=vmem_cap),
    )(x2, w1, params["b1"], gamma, beta)

    # ---- Stage 2: logits = h @ W2 + b2 -------------------------------------
    # Grid: vocab OUTER, rows INNER -> each W2 tile streams from HBM exactly
    # once and stays VMEM-resident across all row tiles.  Both axes are
    # independent => 'parallel' (v7x megacore shards the vocab axis).
    if h_resident:
        h_spec = pl.BlockSpec((n_pad, hidden), lambda j, i: (0, 0))
    else:
        h_spec = pl.BlockSpec((tm, hidden), lambda j, i: (i, 0))

    logits = pl.pallas_call(
        functools.partial(_stage2_kernel, h_resident=h_resident, tm=tm),
        out_shape=jax.ShapeDtypeStruct((n_pad, v_pad), out_dtype),
        grid_spec=pltpu.PrefetchScalarGridSpec(
            num_scalar_prefetch=0,
            grid=(v_pad // tv, n_pad // tm),
            in_specs=[
                h_spec,                                           # h
                pl.BlockSpec((hidden, tv), lambda j, i: (0, j)),  # W2 tile
                pl.BlockSpec((1, tv),      lambda j, i: (0, j)),  # bias tile
            ],
            out_specs=pl.BlockSpec((tm, tv), lambda j, i: (i, j)),
        ),
        compiler_params=pltpu.CompilerParams(
            dimension_semantics=("parallel", "parallel"),
            vmem_limit_bytes=vmem_cap),
    )(h, w2, b2)

    if n_pad != n or v_pad != vocab:
        logits = logits[:n, :vocab]
    return logits.reshape(batch, seq, vocab)


# --------------------------------------------------------------------------
# Pure-JAX reference (matches the PyTorch module in f32)
# --------------------------------------------------------------------------
def reference_forward(x, w1, b1, gamma, beta, w2, b2, eps=1e-12):
    h = jnp.einsum("bsd,dh->bsh", x, w1) + b1
    h = 0.5 * h * (1.0 + jax.lax.erf(h / jnp.sqrt(2.0)))
    mean = jnp.mean(h, axis=-1, keepdims=True)
    var = jnp.mean((h - mean) ** 2, axis=-1, keepdims=True)
    h = (h - mean) / jnp.sqrt(var + eps) * gamma + beta
    return jnp.einsum("bsh,hv->bsv", h, w2) + b2


if __name__ == "__main__":
    # Small shapes consistent with the module's forward.
    batch, seq = 2, 8
    input_size, hidden_size, vocab_size = 32, 128, 256
    eps = 1e-12

    key = jax.random.PRNGKey(0)
    kx, k1, kb1, kg, kb, k2 = jax.random.split(key, 6)

    x = jax.random.normal(kx, (batch, seq, input_size), jnp.float32)

    # Deterministic synthetic parameters (weights stored as [in, out]).
    w1 = jax.random.normal(k1, (input_size, hidden_size), jnp.float32) * 0.05
    b1 = jax.random.normal(kb1, (hidden_size,), jnp.float32) * 0.02
    gamma = 1.0 + 0.1 * jax.random.normal(kg, (hidden_size,), jnp.float32)
    beta = 0.05 * jax.random.normal(kb, (hidden_size,), jnp.float32)
    w2 = jax.random.normal(k2, (hidden_size, vocab_size), jnp.float32) * 0.05
    b2 = jnp.zeros((vocab_size,), jnp.float32)   # self.bias init = zeros

    ref = reference_forward(x, w1, b1, gamma, beta, w2, b2, eps=eps)

    # ---- Exact path: f32 matmuls, tight tolerance --------------------------
    params_f32 = prepare_decoder_weights(w1, b1, gamma, beta, w2, b2,
                                         matmul_dtype=jnp.float32)
    out_f32 = decoder_forward(x, params_f32, layer_norm_eps=eps,
                              out_dtype=jnp.float32)
    out_f32 = jax.block_until_ready(out_f32)
    assert out_f32.shape == (batch, seq, vocab_size)
    assert jnp.allclose(out_f32, ref, atol=1e-4, rtol=1e-4), "f32 path mismatch"

    # ---- Fast path: bf16 matmul operands (and bf16-stored h), f32 accum ----
    params_bf = prepare_decoder_weights(w1, b1, gamma, beta, w2, b2,
                                        matmul_dtype=jnp.bfloat16)
    out_bf = decoder_forward(x, params_bf, layer_norm_eps=eps,
                             out_dtype=jnp.float32)
    out_bf = jax.block_until_ready(out_bf)
    assert out_bf.shape == (batch, seq, vocab_size)
    assert jnp.allclose(out_bf, ref, atol=5e-2, rtol=5e-2), "bf16 path mismatch"

    # ---- Fast path with bf16 logits (halves the dominant HBM write) --------
    out_bf16out = decoder_forward(x, params_bf, layer_norm_eps=eps,
                                  out_dtype=jnp.bfloat16)
    out_bf16out = jax.block_until_ready(out_bf16out)
    assert out_bf16out.shape == (batch, seq, vocab_size)
    assert jnp.allclose(out_bf16out.astype(jnp.float32), ref,
                        atol=1e-1, rtol=1e-1), "bf16-out path mismatch"

    print("KERNEL_OK")
</pallas_src>

<mosaic_0001>
module attributes {stable_mosaic.version = 11 : i64} {
  func.func @_stage1_kernel(%arg0: i32, %arg1: memref<16x32xf32, #tpu.memory_space<vmem>>, %arg2: memref<32x128xf32, #tpu.memory_space<vmem>>, %arg3: memref<1x128xf32, #tpu.memory_space<vmem>>, %arg4: memref<1x128xf32, #tpu.memory_space<vmem>>, %arg5: memref<1x128xf32, #tpu.memory_space<vmem>>, %arg6: memref<16x128xf32, #tpu.memory_space<vmem>>) attributes {dimension_semantics = [#tpu.dimension_semantics<parallel>], iteration_bounds = array<i64: 1>, scalar_prefetch = 0 : i64, scratch_operands = 0 : i64, tpu.core_type = #tpu.core_type<tc>, window_params = [{transform_indices = @transform_0, window_bounds = array<i64: 16, 32>}, {pipeline_mode = #tpu.pipeline_mode<synchronous>, transform_indices = @transform_1, window_bounds = array<i64: 32, 128>}, {pipeline_mode = #tpu.pipeline_mode<synchronous>, transform_indices = @transform_2, window_bounds = array<i64: 1, 128>}, {pipeline_mode = #tpu.pipeline_mode<synchronous>, transform_indices = @transform_3, window_bounds = array<i64: 1, 128>}, {pipeline_mode = #tpu.pipeline_mode<synchronous>, transform_indices = @transform_4, window_bounds = array<i64: 1, 128>}, {transform_indices = @transform_5, window_bounds = array<i64: 16, 128>}]} {
    %c0 = arith.constant 0 : index
    %c0_0 = arith.constant 0 : index
    %0 = vector.load %arg1[%c0, %c0_0] : memref<16x32xf32, #tpu.memory_space<vmem>>, vector<16x32xf32>
    %c0_1 = arith.constant 0 : index
    %c0_2 = arith.constant 0 : index
    %1 = vector.load %arg2[%c0_1, %c0_2] : memref<32x128xf32, #tpu.memory_space<vmem>>, vector<32x128xf32>
    %cst = arith.constant dense<0.000000e+00> : vector<16x128xf32>
    %2 = tpu.matmul %0, %1, %cst {dimension_numbers = #tpu.dot_dimension_numbers<[1], [0], [0], [1], [0, 0, 1, 1], [], []>} : vector<16x32xf32>, vector<32x128xf32>, vector<16x128xf32> -> vector<16x128xf32>
    %c0_3 = arith.constant 0 : index
    %c0_4 = arith.constant 0 : index
    %3 = vector.load %arg3[%c0_3, %c0_4] : memref<1x128xf32, #tpu.memory_space<vmem>>, vector<1x128xf32>
    %4 = vector.broadcast %3 : vector<1x128xf32> to vector<16x128xf32>
    %5 = arith.addf %2, %4 : vector<16x128xf32>
    %cst_5 = arith.constant 5.000000e-01 : f32
    %6 = vector.broadcast %cst_5 : f32 to vector<16x128xf32>
    %7 = arith.mulf %6, %5 : vector<16x128xf32>
    %cst_6 = arith.constant 0.707106769 : f32
    %8 = vector.broadcast %cst_6 : f32 to vector<16x128xf32>
    %9 = arith.mulf %5, %8 : vector<16x128xf32>
    %10 = math.erf %9 : vector<16x128xf32>
    %cst_7 = arith.constant 1.000000e+00 : f32
    %11 = vector.broadcast %cst_7 : f32 to vector<16x128xf32>
    %12 = arith.addf %11, %10 : vector<16x128xf32>
    %13 = arith.mulf %7, %12 : vector<16x128xf32>
    %cst_8 = arith.constant dense<0.000000e+00> : vector<16xf32>
    %14 = vector.multi_reduction <add>, %13, %cst_8 [1] : vector<16x128xf32> to vector<16xf32>
    %15 = vector.shape_cast %14 : vector<16xf32> to vector<16x1xf32>
    %cst_9 = arith.constant 1.280000e+02 : f32
    %16 = vector.broadcast %cst_9 : f32 to vector<16x1xf32>
    %17 = arith.divf %15, %16 : vector<16x1xf32>
    %18 = vector.broadcast %17 : vector<16x1xf32> to vector<16x128xf32>
    %19 = arith.subf %13, %18 : vector<16x128xf32>
    %20 = vector.broadcast %17 : vector<16x1xf32> to vector<16x128xf32>
    %21 = arith.subf %13, %20 : vector<16x128xf32>
    %22 = arith.mulf %19, %21 : vector<16x128xf32>
    %cst_10 = arith.constant dense<0.000000e+00> : vector<16xf32>
    %23 = vector.multi_reduction <add>, %22, %cst_10 [1] : vector<16x128xf32> to vector<16xf32>
    %24 = vector.shape_cast %23 : vector<16xf32> to vector<16x1xf32>
    %cst_11 = arith.constant 1.280000e+02 : f32
    %25 = vector.broadcast %cst_11 : f32 to vector<16x1xf32>
    %26 = arith.divf %24, %25 : vector<16x1xf32>
    %27 = vector.broadcast %17 : vector<16x1xf32> to vector<16x128xf32>
    %28 = arith.subf %13, %27 : vector<16x128xf32>
    %cst_12 = arith.constant 9.99999996E-13 : f32
    %29 = vector.broadcast %cst_12 : f32 to vector<16x1xf32>
    %30 = arith.addf %26, %29 : vector<16x1xf32>
    %31 = math.rsqrt %30 : vector<16x1xf32>
    %32 = vector.broadcast %31 : vector<16x1xf32> to vector<16x128xf32>
    %33 = arith.mulf %28, %32 : vector<16x128xf32>
    %c0_13 = arith.constant 0 : index
    %c0_14 = arith.constant 0 : index
    %34 = vector.load %arg4[%c0_13, %c0_14] : memref<1x128xf32, #tpu.memory_space<vmem>>, vector<1x128xf32>
    %35 = vector.broadcast %34 : vector<1x128xf32> to vector<16x128xf32>
    %36 = arith.mulf %33, %35 : vector<16x128xf32>
    %c0_15 = arith.constant 0 : index
    %c0_16 = arith.constant 0 : index
    %37 = vector.load %arg5[%c0_15, %c0_16] : memref<1x128xf32, #tpu.memory_space<vmem>>, vector<1x128xf32>
    %38 = vector.broadcast %37 : vector<1x128xf32> to vector<16x128xf32>
    %39 = arith.addf %36, %38 : vector<16x128xf32>
    %c0_17 = arith.constant 0 : index
    %c0_18 = arith.constant 0 : index
    %40 = vector.load %arg6[%c0_17, %c0_18] : memref<16x128xf32, #tpu.memory_space<vmem>>, vector<16x128xf32>
    tpu.vector_store %arg6[%c0_17, %c0_18], %39 {strides = array<i32>} : memref<16x128xf32, #tpu.memory_space<vmem>>, vector<16x128xf32>,
    return
  }
  func.func @transform_0(%arg0: i32) -> (i32, i32) {
    %c0_i32 = arith.constant 0 : i32
    %c0_i32_0 = arith.constant 0 : i32
    return %arg0, %c0_i32 : i32, i32
  }
  func.func @transform_1(%arg0: i32) -> (i32, i32) {
    %c0_i32 = arith.constant 0 : i32
    %c0_i32_0 = arith.constant 0 : i32
    %c0_i32_1 = arith.constant 0 : i32
    return %c0_i32, %c0_i32_0 : i32, i32
  }
  func.func @transform_2(%arg0: i32) -> (i32, i32) {
    %c0_i32 = arith.constant 0 : i32
    %c0_i32_0 = arith.constant 0 : i32
    %c0_i32_1 = arith.constant 0 : i32
    return %c0_i32, %c0_i32_0 : i32, i32
  }
  func.func @transform_3(%arg0: i32) -> (i32, i32) {
    %c0_i32 = arith.constant 0 : i32
    %c0_i32_0 = arith.constant 0 : i32
    %c0_i32_1 = arith.constant 0 : i32
    return %c0_i32, %c0_i32_0 : i32, i32
  }
  func.func @transform_4(%arg0: i32) -> (i32, i32) {
    %c0_i32 = arith.constant 0 : i32
    %c0_i32_0 = arith.constant 0 : i32
    %c0_i32_1 = arith.constant 0 : i32
    return %c0_i32, %c0_i32_0 : i32, i32
  }
  func.func @transform_5(%arg0: i32) -> (i32, i32) {
    %c0_i32 = arith.constant 0 : i32
    %c0_i32_0 = arith.constant 0 : i32
    return %arg0, %c0_i32 : i32, i32
  }
}

</mosaic_0001>

<bundles_post_ra>
// kernel: tpu_custom_call.1
= control target key start
LH: loop header
LB: loop body
LE: loop exit
PB: predicated region body
PF: predicated region fallthrough
CT: control target
= control target key end

     0   :  { %10 = vsyncpa [#allocation3], 0  ;;  %s419_s0 = inlined_call_operand.hbm [shape: f32[16,32], index: 0, kind: input, shape index: {}]   ;;  %s420_s1 = inlined_call_operand.hbm [shape: f32[32,128], index: 1, kind: input, shape index: {}]   ;;  %s421_s2 = inlined_call_operand.vmem [shape: f32[1,128], index: 2, kind: input, shape index: {}]   ;;  %s422_s3 = inlined_call_operand.vmem [shape: f32[1,128], index: 3, kind: input, shape index: {}]   ;;  %s423_s4 = inlined_call_operand.vmem [shape: f32[1,128], index: 4, kind: input, shape index: {}]   ;;  %s424_s5 = inlined_call_operand.hbm [shape: f32[16,128], index: 5, kind: output, shape index: {}]  }
   0x1   :  { %11 = vsyncpa [#allocation6], 0 }
   0x2   :  { %12 = vsyncpa [#allocation4], 0  ;;  %s330_s18 = smov [#allocation2]   ;;  %s258_s22 = scalar_lea.hbm %s419_s0, 256 }
   0x3   :  { %s18_s19 = sshll.u32 %s330_s18, 4  ;;  %p259_p0 = scmp.ne.s32.totalorder %s419_s0, %s258_s22  ;;  %s19_s19 = int_to_ptr.vmem [resolvable:$true] %s18_s19 }
   0x4   :  { %p262_p1 = scmp.lt.u32.totalorder %s258_s22, %s419_s0 }
   0x6   :  { %p264_p2 = pnand %p262_p1, %p259_p0 }
   0x8   :  { %267 = shalt.err (!%p264_p2)
}
   0x9   :  { %s268_s27 = scalar_lea.vmem %s19_s19, 256  ;;  %p273_p4 = scmp.lt.s32.totalorder %s19_s19, %s19_s19 }
   0xa   :  { %p269_p3 = scmp.ne.s32.totalorder %s19_s19, %s268_s27  ;;  %p274_p5 = scmp.lt.s32.totalorder %s268_s27, %s268_s27 }
   0xc   :  { %p275_p6 = por %p274_p5, %p273_p4 }
   0xe   :  { %p276_p7 = pnand %p275_p6, %p269_p3 }
  0x10   :  { %279 = shalt.err (!%p276_p7)
}
  0x11   :  { %s331_s28 = smov 128   ;;  %s332_s29 = smov 8  }
  0x12   :  { %24 = dma.hbm_to_vmem [thread:$0]  %s419_s0, 256, %s19_s19, [#allocation3], %s331_s28, %s331_s28, %s332_s29  }
  0x13   :  { %s333_s7 = smov [#allocation5]   ;;  %s280_s11 = scalar_lea.hbm %s420_s1, 512 }
  0x14   :  { %s30_s8 = sshll.u32 %s333_s7, 4  ;;  %p281_p8 = scmp.ne.s32.totalorder %s420_s1, %s280_s11  ;;  %s31_s8 = int_to_ptr.vmem [resolvable:$true] %s30_s8 }
  0x15   :  { %p284_p9 = scmp.lt.u32.totalorder %s280_s11, %s420_s1 }
  0x17   :  { %p286_p10 = pnand %p284_p9, %p281_p8 }
  0x19   :  { %289 = shalt.err (!%p286_p10)
}
  0x1a   :  { %s290_s16 = scalar_lea.vmem %s31_s8, 512  ;;  %p295_p12 = scmp.lt.s32.totalorder %s31_s8, %s31_s8 }
  0x1b   :  { %p291_p11 = scmp.ne.s32.totalorder %s31_s8, %s290_s16  ;;  %p296_p13 = scmp.lt.s32.totalorder %s290_s16, %s290_s16 }
  0x1d   :  { %p297_p0 = por %p296_p13, %p295_p12 }
  0x1f   :  { %p298_p1 = pnand %p297_p0, %p291_p11 }
  0x21   :  { %301 = shalt.err (!%p298_p1)
}
  0x22   :  { %36 = dma.hbm_to_vmem [thread:$0]  %s420_s1, 512, %s31_s8, [#allocation6], %s331_s28, %s331_s28, %s332_s29  }
  0x23   :  { %324 = dma.done.wait [#allocation3], 256  }
  0x24   :  { %325 = vsyncadd [#allocation3], 4294967040 }
  0x25   :  { %326 = dma.done.wait [#allocation6], 512  }
  0x26   :  { %327 = vsyncadd [#allocation6], 4294966784  ;;  %vm62_vm0 = vcmask 261120   ;;  %v51_v0 = vld [vmem:[#allocation5] sm:$0xff]  ;;  %v52_v1 = vld [vmem:[#allocation5 + $0x8] sm:$0xff]  ;;  %s334_s22 = smov [#allocation7]  }
  0x27   :  { %v53_v2 = vld [vmem:[#allocation5 + $0x10] sm:$0xff]  ;;  %v237_v3 = vpack.c.bf16 %v52_v1, %v51_v0  ;;  %v54_v4 = vld [vmem:[#allocation5 + $0x18] sm:$0xff]  ;;  %s202_s23 = sshll.u32 %s334_s22, 4  ;;  %s203_s23 = int_to_ptr.vmem [resolvable:$true] %s202_s23 }
  0x28   :  { %v49_v5 = vld [vmem:[#allocation2] sm:$0xff]  ;;  %v241_v6 = vpack.c.bf16 %v54_v4, %v53_v2  ;;  %v50_v7 = vld [vmem:[#allocation2 + $0x8] sm:$0xff]  ;;  %s302_s24 = scalar_lea.vmem %s203_s23, 256  ;;  %p307_p3 = scmp.lt.s32.totalorder %s203_s23, %s203_s23 }
  0x29   :  { %234 = vmatprep.mubr.msk.f32.mxu0 %vm62_vm0, %v49_v5  ;;  %238 = vmatprep.subr.bf16.mxu0 %v237_v3  ;;  %v215_v8 = vld [vmem:[%s421_s2] ss:$0 sm:$0xff]  ;;  %p303_p2 = scmp.ne.s32.totalorder %s203_s23, %s302_s24  ;;  %p308_p4 = scmp.lt.s32.totalorder %s302_s24, %s302_s24 }
  0x2a   :  { %240 = vmatpush3.bf16.msra.mxu0 %v237_v3  ;;  %v218_v38 = vld [vmem:[%s422_s3] ss:$0 sm:$0xff] }
  0x2b   :  { %242 = vmatprep.subr.bf16.mxu0 %v241_v6  ;;  %v219_v40 = vld [vmem:[%s423_s4] ss:$0 sm:$0xff]  ;;  %p309_p5 = por %p308_p4, %p307_p3 }
  0x2d   :  { %p310_p6 = pnand %p309_p5, %p303_p2 }
  0x2e   :  { %244 = vmatpush3.bf16.msra.mxu0 %v241_v6 }
  0x31   :  { %235 = vmatmul.mubr.msk.f32.vlgmr.msra.gmra.mrb[0].mxu0 %vm62_vm0, %v50_v7 }
 0x104   :  { %v236_v9 = vpop.f32.mrb[0].mxu0 }
 0x105   :  { %v141_v10 = vadd.f32 %v236_v9, %v215_v8  ;;  %v135_v11 = vpop.f32.mrb[1].mxu0 }
 0x106   :  { %v136_v12 = vadd.f32 %v215_v8, %v135_v11 }
 0x107   :  { %v147_v13 = vmul.f32 0.70710677, %v141_v10  ;;  %v145_v21 = vmul.f32 0.5, %v141_v10 }
 0x108   :  { %v146_v14 = vmul.f32 0.70710677, %v136_v12  ;;  %v144_v17 = vmul.f32 0.5, %v136_v12 }
 0x109   :  { %250 = verf.f32 %v147_v13 }
 0x10a   :  { %252 = verf.f32 %v146_v14 }
 0x113   :  { %v251_v15 = vpop.eup %250 }
 0x114   :  { %v253_v16 = vpop.eup %252  ;;  %v151_v20 = vadd.f32 1.0, %v251_v15 }
 0x115   :  { %v150_v18 = vadd.f32 1.0, %v253_v16 }
 0x116   :  { %v153_v22 = vmul.f32 %v151_v20, %v145_v21 }
 0x117   :  { %v152_v19 = vmul.f32 %v150_v18, %v144_v17 }
 0x119   :  { %154 = vadd.xlane.f32.xlu0 %v152_v19 }
 0x11d   :  { %156 = vadd.xlane.f32.xlu0 %v153_v22 }
 0x1a6   :  { %v155_v23 = vpop.xlane.xlu0 %154 }
 0x1a7   :  { %v159_v24 = vmul.f32 0.0078125, %v155_v23 }
 0x1a9   :  { %v161_v25 = vsub.f32 %v152_v19, %v159_v24 }
 0x1aa   :  { %v157_v26 = vpop.xlane.xlu0 %156 }
 0x1ab   :  { %v160_v27 = vmul.f32 0.0078125, %v157_v26  ;;  %v163_v28 = vmul.f32 %v161_v25, %v161_v25 }
 0x1ad   :  { %v162_v29 = vsub.f32 %v153_v22, %v160_v27  ;;  %165 = vadd.xlane.f32.xlu1 %v163_v28 }
 0x1af   :  { %v164_v30 = vmul.f32 %v162_v29, %v162_v29 }
 0x1b1   :  { %167 = vadd.xlane.f32.xlu1 %v164_v30 }
 0x23a   :  { %v166_v31 = vpop.xlane.xlu1 %165 }
 0x23b   :  { %v169_v32 = vmul.f32 0.0078125, %v166_v31 }
 0x23d   :  { %v171_v33 = vadd.f32 1e-12, %v169_v32 }
 0x23e   :  { %v168_v34 = vpop.xlane.xlu1 %167 }
 0x23f   :  { %254 = vrsqrt.f32 %v171_v33  ;;  %v170_v35 = vmul.f32 0.0078125, %v168_v34 }
 0x241   :  { %v172_v36 = vadd.f32 1e-12, %v170_v35 }
 0x243   :  { %256 = vrsqrt.f32 %v172_v36 }
 0x249   :  { %v255_v37 = vpop.eup %254 }
 0x24a   :  { %v175_v39 = vmul.f32 %v255_v37, %v161_v25 }
 0x24c   :  { %v184_v41 = vmul.f32 %v218_v38, %v175_v39 }
 0x24d   :  { %v257_v42 = vpop.eup %256 }
 0x24e   :  { %v176_v43 = vmul.f32 %v257_v42, %v162_v29  ;;  %v193_v44 = vadd.f32 %v219_v40, %v184_v41 }
 0x250   :  { %v185_v45 = vmul.f32 %v218_v38, %v176_v43  ;;  %195 = vst [vmem:[#allocation7] sm:$0xff] %v193_v44 }
 0x252   :  { %v194_v46 = vadd.f32 %v219_v40, %v185_v45 }
 0x254   :  { %196 = vst [vmem:[#allocation7 + $0x8] sm:$0xff] %v194_v46 }
 0x255   :  { %313 = shalt.err (!%p310_p6)
}
 0x256   :  { %s314_s25 = scalar_lea.hbm %s424_s5, 256 }
 0x257   :  { %p315_p7 = scmp.ne.s32.totalorder %s424_s5, %s314_s25  ;;  %p318_p8 = scmp.lt.u32.totalorder %s314_s25, %s424_s5 }
 0x259   :  { %p320_p9 = pnand %p318_p8, %p315_p7 }
 0x25b   :  { %323 = shalt.err (!%p320_p9)
}
 0x25c   :  { %208 = dma.vmem_to_hbm [thread:$0]  %s203_s23, 256, %s424_s5, [#allocation4], %s331_s28, %s331_s28, %s332_s29  }
 0x25d   :  { %328 = dma.done.wait [#allocation4], 256  }
 0x25e   :  { %329 = vsyncadd [#allocation4], 4294967040 }
 0x25f   :  { %212 = vsyncpa [#allocation3], 1 }
 0x260   :  { %213 = vsyncpa [#allocation6], 1 }
 0x261   :  { %214 = vsyncpa [#allocation4], 1 }

</bundles_post_ra>
